<compile_context>
chip_gen: v7x
topology: tpu7x:2x2x1
jax: 0.10.0
libtpu: 0.0.40
codegen_flags: <defaults>
</compile_context>

<pallas_src>
import jax
import jax.numpy as jnp
from jax.experimental import pallas as pl
from jax.experimental.pallas import tpu as pltpu

LANES = 128


def rlagnet_kernel(x_ref, w1b_ref, b1b_ref, w2b_ref, sel_ref, thr_ref, o_ref):
    # x tile is lane-dense: each 128-lane row packs G consecutive batch samples.
    x = x_ref[...]                                                   # (tbd, 128)
    # conv_reduce for all packed samples at once via block-diagonal W1.
    h = jnp.dot(x, w1b_ref[...], preferred_element_type=jnp.float32)  # (tbd, G*R)
    h = jnp.maximum(h + b1b_ref[...], 0.0)
    # conv_expand: VPU multiply by the tiled w2 row, then a selection matmul
    # that both sums each sample's R terms and broadcasts the resulting logit
    # across that sample's C lanes.
    p = h * w2b_ref[...]                                             # (tbd, G*R)
    logits = jnp.dot(p, sel_ref[...], preferred_element_type=jnp.float32)  # (tbd, 128)
    # sigmoid(z) > t  <=>  z > logit(t); b2 already folded into thr.
    thr = thr_ref[0]
    xs = x_ref[...]                  # re-read at the store: keeps live ranges short
    o_ref[...] = jnp.where(logits > thr, xs, jnp.zeros_like(xs)).astype(o_ref.dtype)


def rlagnet_forward(x, w1, b1, w2, b2, threshold, *, block_rows=512):
    """Fused RLagnet forward.

    x: (B, C); w1: (C, R) conv_reduce weight (x @ w1 layout); b1: (R,)
    w2: (R, 1) conv_expand weight; b2: (1,); threshold: scalar gate threshold.
    """
    B, C = x.shape
    R = w1.shape[1]
    assert LANES % C == 0, "lane-dense path requires in_chs to divide 128"
    G = LANES // C                          # samples packed per 128-lane row

    # Pad batch so it reshapes cleanly into 128-lane rows (padded rows are zero
    # and gate to zero; they are sliced off at the end).
    Bp = ((B + G - 1) // G) * G
    if Bp != B:
        x = jnp.pad(x, ((0, Bp - B), (0, 0)))
    Bd = (Bp * C) // LANES                  # dense rows
    x_dense = x.reshape(Bd, LANES)          # contiguous row-major reshape: free

    f32 = jnp.float32
    # Block-diagonal conv_reduce weight acting on packed rows: (128, G*R).
    w1_block = jnp.kron(jnp.eye(G, dtype=f32), w1.astype(f32))
    b1_block = jnp.tile(b1.astype(f32), G).reshape(1, G * R)
    w2_block = jnp.tile(w2.astype(f32).reshape(-1), G).reshape(1, G * R)
    # Selection matrix: sums each R-sized group and broadcasts over its C lanes.
    sel = (jnp.arange(G * R)[:, None] // R == jnp.arange(LANES)[None, :] // C)
    sel = sel.astype(f32)                   # (G*R, 128)

    # sigmoid(z) > t  <=>  z > logit(t) for t in (0, 1); clamp degenerate ends.
    t = threshold.astype(f32)
    logit_thr = jnp.where(
        t > 0.0,
        jnp.where(t < 1.0, jnp.log(t) - jnp.log1p(-t), jnp.inf),
        -jnp.inf,
    )
    thr_adj = (logit_thr - b2.astype(f32).reshape(())).reshape(1)   # fold b2 in

    tbd = min(block_rows, Bd)               # 512 dense rows = 2048 samples (C=32)
    grid = (pl.cdiv(Bd, tbd),)

    out_dense = pl.pallas_call(
        rlagnet_kernel,
        out_shape=jax.ShapeDtypeStruct((Bd, LANES), x.dtype),
        grid_spec=pltpu.PrefetchScalarGridSpec(
            num_scalar_prefetch=0,
            grid=grid,
            in_specs=[
                pl.BlockSpec((tbd, LANES), lambda i: (i, 0)),      # x (lane-dense)
                pl.BlockSpec((G * C, G * R), lambda i: (0, 0)),    # W1 block-diag
                pl.BlockSpec((1, G * R), lambda i: (0, 0)),        # b1 (tiled)
                pl.BlockSpec((1, G * R), lambda i: (0, 0)),        # w2 (tiled)
                pl.BlockSpec((G * R, LANES), lambda i: (0, 0)),    # selection mat
                pl.BlockSpec(memory_space=pltpu.MemorySpace.SMEM),  # threshold
            ],
            out_specs=pl.BlockSpec((tbd, LANES), lambda i: (i, 0)),
        ),
        compiler_params=pltpu.CompilerParams(
            dimension_semantics=("parallel",),
        ),
    )(x_dense, w1_block, b1_block, w2_block, sel, thr_adj)

    out = out_dense.reshape(Bp, C)
    return out[:B] if Bp != B else out


def rlagnet_reference(x, w1, b1, w2, b2, threshold):
    h = jnp.maximum(x @ w1 + b1, 0.0)
    attn = jax.nn.sigmoid(h @ w2 + b2)
    gate = jnp.where(attn > threshold, 1.0, 0.0)
    return x * gate


if __name__ == "__main__":
    # Module config: in_chs=32, se_ratio=0.25 -> reduced_chs=8
    B, in_chs = 64, 32
    reduced_chs = int(in_chs * 0.25)

    key = jax.random.PRNGKey(0)
    kx, k1, kb1, k2, kb2 = jax.random.split(key, 5)

    x = jax.random.normal(kx, (B, in_chs), dtype=jnp.float32)
    # conv_reduce: Linear(in_chs, reduced_chs); stored as (in, out) for x @ W
    w1 = jax.random.normal(k1, (in_chs, reduced_chs), dtype=jnp.float32) * 0.1
    b1 = jax.random.normal(kb1, (reduced_chs,), dtype=jnp.float32) * 0.1
    # conv_expand: Linear(reduced_chs, 1)
    w2 = jax.random.normal(k2, (reduced_chs, 1), dtype=jnp.float32) * 0.1
    b2 = jax.random.normal(kb2, (1,), dtype=jnp.float32) * 0.1
    # threshold parameter (init 0.5 in the module)
    threshold = jnp.array(0.5, dtype=jnp.float32)

    out = rlagnet_forward(x, w1, b1, w2, b2, threshold)
    out = jax.block_until_ready(out)

    ref = rlagnet_reference(x, w1, b1, w2, b2, threshold)
    assert out.shape == (B, in_chs)
    assert jnp.allclose(out, ref, atol=1e-5, rtol=1e-5), "mismatch vs reference"

    print("KERNEL_OK")
</pallas_src>

<mosaic_0001>
module attributes {stable_mosaic.version = 11 : i64} {
  func.func @rlagnet_kernel(%arg0: i32, %arg1: memref<16x128xf32, #tpu.memory_space<vmem>>, %arg2: memref<128x32xf32, #tpu.memory_space<vmem>>, %arg3: memref<1x32xf32, #tpu.memory_space<vmem>>, %arg4: memref<1x32xf32, #tpu.memory_space<vmem>>, %arg5: memref<32x128xf32, #tpu.memory_space<vmem>>, %arg6: memref<1xf32, #tpu.memory_space<smem>>, %arg7: memref<16x128xf32, #tpu.memory_space<vmem>>) attributes {dimension_semantics = [#tpu.dimension_semantics<parallel>], iteration_bounds = array<i64: 1>, scalar_prefetch = 0 : i64, scratch_operands = 0 : i64, tpu.core_type = #tpu.core_type<tc>, window_params = [{transform_indices = @transform_0, window_bounds = array<i64: 16, 128>}, {pipeline_mode = #tpu.pipeline_mode<synchronous>, transform_indices = @transform_1, window_bounds = array<i64: 128, 32>}, {pipeline_mode = #tpu.pipeline_mode<synchronous>, transform_indices = @transform_2, window_bounds = array<i64: 1, 32>}, {pipeline_mode = #tpu.pipeline_mode<synchronous>, transform_indices = @transform_3, window_bounds = array<i64: 1, 32>}, {pipeline_mode = #tpu.pipeline_mode<synchronous>, transform_indices = @transform_4, window_bounds = array<i64: 32, 128>}, {transform_indices = @transform_5, window_bounds = array<i64: 1>}, {transform_indices = @transform_6, window_bounds = array<i64: 16, 128>}]} {
    %c0 = arith.constant 0 : index
    %c0_0 = arith.constant 0 : index
    %0 = vector.load %arg1[%c0, %c0_0] : memref<16x128xf32, #tpu.memory_space<vmem>>, vector<16x128xf32>
    %c0_1 = arith.constant 0 : index
    %c0_2 = arith.constant 0 : index
    %1 = vector.load %arg2[%c0_1, %c0_2] : memref<128x32xf32, #tpu.memory_space<vmem>>, vector<128x32xf32>
    %cst = arith.constant dense<0.000000e+00> : vector<16x32xf32>
    %2 = tpu.matmul %0, %1, %cst {dimension_numbers = #tpu.dot_dimension_numbers<[1], [0], [0], [1], [0, 0, 1, 1], [], []>} : vector<16x128xf32>, vector<128x32xf32>, vector<16x32xf32> -> vector<16x32xf32>
    %c0_3 = arith.constant 0 : index
    %c0_4 = arith.constant 0 : index
    %3 = vector.load %arg3[%c0_3, %c0_4] : memref<1x32xf32, #tpu.memory_space<vmem>>, vector<1x32xf32>
    %4 = vector.broadcast %3 : vector<1x32xf32> to vector<16x32xf32>
    %5 = arith.addf %2, %4 : vector<16x32xf32>
    %cst_5 = arith.constant 0.000000e+00 : f32
    %6 = vector.broadcast %cst_5 : f32 to vector<16x32xf32>
    %7 = arith.maximumf %5, %6 : vector<16x32xf32>
    %c0_6 = arith.constant 0 : index
    %c0_7 = arith.constant 0 : index
    %8 = vector.load %arg4[%c0_6, %c0_7] : memref<1x32xf32, #tpu.memory_space<vmem>>, vector<1x32xf32>
    %9 = vector.broadcast %8 : vector<1x32xf32> to vector<16x32xf32>
    %10 = arith.mulf %7, %9 : vector<16x32xf32>
    %c0_8 = arith.constant 0 : index
    %c0_9 = arith.constant 0 : index
    %11 = vector.load %arg5[%c0_8, %c0_9] : memref<32x128xf32, #tpu.memory_space<vmem>>, vector<32x128xf32>
    %cst_10 = arith.constant dense<0.000000e+00> : vector<16x128xf32>
    %12 = tpu.matmul %10, %11, %cst_10 {dimension_numbers = #tpu.dot_dimension_numbers<[1], [0], [0], [1], [0, 0, 1, 1], [], []>} : vector<16x32xf32>, vector<32x128xf32>, vector<16x128xf32> -> vector<16x128xf32>
    %c0_11 = arith.constant 0 : index
    %13 = memref.load %arg6[%c0_11] : memref<1xf32, #tpu.memory_space<smem>>
    %c0_12 = arith.constant 0 : index
    %c0_13 = arith.constant 0 : index
    %14 = vector.load %arg1[%c0_12, %c0_13] : memref<16x128xf32, #tpu.memory_space<vmem>>, vector<16x128xf32>
    %15 = vector.broadcast %13 : f32 to vector<16x128xf32>
    %16 = arith.cmpf ogt, %12, %15 : vector<16x128xf32>
    %cst_14 = arith.constant 0.000000e+00 : f32
    %17 = vector.broadcast %cst_14 : f32 to vector<16x128xf32>
    %18 = arith.select %16, %14, %17 : vector<16x128xi1>, vector<16x128xf32>
    %c0_15 = arith.constant 0 : index
    %c0_16 = arith.constant 0 : index
    %19 = vector.load %arg7[%c0_15, %c0_16] : memref<16x128xf32, #tpu.memory_space<vmem>>, vector<16x128xf32>
    tpu.vector_store %arg7[%c0_15, %c0_16], %18 {strides = array<i32>} : memref<16x128xf32, #tpu.memory_space<vmem>>, vector<16x128xf32>,
    return
  }
  func.func @transform_0(%arg0: i32) -> (i32, i32) {
    %c0_i32 = arith.constant 0 : i32
    %c0_i32_0 = arith.constant 0 : i32
    return %arg0, %c0_i32 : i32, i32
  }
  func.func @transform_1(%arg0: i32) -> (i32, i32) {
    %c0_i32 = arith.constant 0 : i32
    %c0_i32_0 = arith.constant 0 : i32
    %c0_i32_1 = arith.constant 0 : i32
    return %c0_i32, %c0_i32_0 : i32, i32
  }
  func.func @transform_2(%arg0: i32) -> (i32, i32) {
    %c0_i32 = arith.constant 0 : i32
    %c0_i32_0 = arith.constant 0 : i32
    %c0_i32_1 = arith.constant 0 : i32
    return %c0_i32, %c0_i32_0 : i32, i32
  }
  func.func @transform_3(%arg0: i32) -> (i32, i32) {
    %c0_i32 = arith.constant 0 : i32
    %c0_i32_0 = arith.constant 0 : i32
    %c0_i32_1 = arith.constant 0 : i32
    return %c0_i32, %c0_i32_0 : i32, i32
  }
  func.func @transform_4(%arg0: i32) -> (i32, i32) {
    %c0_i32 = arith.constant 0 : i32
    %c0_i32_0 = arith.constant 0 : i32
    %c0_i32_1 = arith.constant 0 : i32
    return %c0_i32, %c0_i32_0 : i32, i32
  }
  func.func @transform_5(%arg0: i32) -> i32 {
    %c0_i32 = arith.constant 0 : i32
    %c0_i32_0 = arith.constant 0 : i32
    return %c0_i32 : i32
  }
  func.func @transform_6(%arg0: i32) -> (i32, i32) {
    %c0_i32 = arith.constant 0 : i32
    %c0_i32_0 = arith.constant 0 : i32
    return %arg0, %c0_i32 : i32, i32
  }
}

</mosaic_0001>

<bundles_post_ra>
// kernel: tpu_custom_call.1
= control target key start
LH: loop header
LB: loop body
LE: loop exit
PB: predicated region body
PF: predicated region fallthrough
CT: control target
= control target key end

     0   :  { %s516_s0 = inlined_call_operand.vmem [shape: f32[16,128], index: 0, kind: input, shape index: {}]   ;;  %s517_s1 = inlined_call_operand.vmem [shape: f32[128,32], index: 1, kind: input, shape index: {}]   ;;  %s518_s2 = inlined_call_operand.vmem [shape: f32[1,32], index: 2, kind: input, shape index: {}]   ;;  %s519_s3 = inlined_call_operand.vmem [shape: f32[1,32], index: 3, kind: input, shape index: {}]   ;;  %s520_s4 = inlined_call_operand.vmem [shape: f32[32,128], index: 4, kind: input, shape index: {}]   ;;  %s521_s5 = inlined_call_operand.<no memory space> [shape: f32[1], index: 5, kind: input, shape index: {}]   ;;  %s522_s6 = inlined_call_operand.hbm [shape: f32[16,128], index: 6, kind: output, shape index: {}]  }
   0x1   :  { %v27_v0 = vld [vmem:[%s517_s1] sm:$0xff]  ;;  %v28_v1 = vld [vmem:[%s517_s1 + $0x8] sm:$0xff]  ;;  %v29_v2 = vld [vmem:[%s517_s1 + $0x10] sm:$0xff] }
   0x2   :  { %v320_v3 = vpack.c.bf16 %v28_v1, %v27_v0  ;;  %v30_v4 = vld [vmem:[%s517_s1 + $0x18] sm:$0xff]  ;;  %v31_v6 = vld [vmem:[%s517_s1 + $0x20] sm:$0xff]  ;;  %v32_v7 = vld [vmem:[%s517_s1 + $0x28] sm:$0xff] }
   0x3   :  { %v324_v5 = vpack.c.bf16 %v30_v4, %v29_v2  ;;  %v328_v8 = vpack.c.bf16 %v32_v7, %v31_v6  ;;  %v446_v9 = vld [vmem:[%s516_s0] sm:$0xff]  ;;  %v33_v10 = vld [vmem:[%s517_s1 + $0x30] sm:$0xff]  ;;  %v34_v11 = vld [vmem:[%s517_s1 + $0x38] sm:$0xff] }
   0x4   :  { %321 = vmatprep.subr.bf16.mxu0 %v320_v3  ;;  %306 = vmatprep.mubr.f32.mxu0 %v446_v9 }
   0x5   :  { %323 = vmatpush3.bf16.msra.mxu0 %v320_v3 }
   0x6   :  { %325 = vmatprep.subr.bf16.mxu0 %v324_v5 }
   0x7   :  { %12 = vsyncpa [#allocation4], 0  ;;  %v332_v12 = vpack.c.bf16 %v34_v11, %v33_v10  ;;  %v35_v13 = vld [vmem:[%s517_s1 + $0x40] sm:$0xff]  ;;  %v36_v14 = vld [vmem:[%s517_s1 + $0x48] sm:$0xff]  ;;  %vm140_vm0 = vcmask 261120   ;;  %v223_v42 = vstv %s521_s5 }
   0x8   :  { %v336_v15 = vpack.c.bf16 %v36_v14, %v35_v13  ;;  %v37_v16 = vld [vmem:[%s517_s1 + $0x50] sm:$0xff]  ;;  %v38_v17 = vld [vmem:[%s517_s1 + $0x58] sm:$0xff]  ;;  %v39_v19 = vld [vmem:[%s517_s1 + $0x60] sm:$0xff] }
   0x9   :  { %327 = vmatpush3.bf16.msra.mxu0 %v324_v5  ;;  %v340_v18 = vpack.c.bf16 %v38_v17, %v37_v16  ;;  %v40_v20 = vld [vmem:[%s517_s1 + $0x68] sm:$0xff]  ;;  %v41_v22 = vld [vmem:[%s517_s1 + $0x70] sm:$0xff]  ;;  %v42_v23 = vld [vmem:[%s517_s1 + $0x78] sm:$0xff] }
   0xa   :  { %329 = vmatprep.subr.bf16.mxu0 %v328_v8  ;;  %v344_v21 = vpack.c.bf16 %v40_v20, %v39_v19  ;;  %v348_v24 = vpack.c.bf16 %v42_v23, %v41_v22  ;;  %v26_v25 = vld [vmem:[%s516_s0 + $0x8] sm:$0xff]  ;;  %v136_v26 = vld [vmem:[%s520_s4] sm:$0xff]  ;;  %v138_v29 = vld [vmem:[%s520_s4 + $0x10] sm:$0xff] }
   0xb   :  { %v137_v27 = vld [vmem:[%s520_s4 + $0x8] sm:$0xff]  ;;  %v139_v30 = vld [vmem:[%s520_s4 + $0x18] sm:$0xff]  ;;  %v246_v32 = vld [vmem:[%s518_s2] ss:$0 sm:$0xff]  ;;  %s387_s2 = smov [#allocation3]  }
   0xc   :  { %v352_v28 = vpack.c.bf16 %v137_v27, %v136_v26  ;;  %v356_v31 = vpack.c.bf16 %v139_v30, %v138_v29  ;;  %v247_v38 = vld [vmem:[%s519_s3] ss:$0 sm:$0xff]  ;;  %s235_s20 = sshll.u32 %s387_s2, 4  ;;  %s236_s20 = int_to_ptr.vmem [resolvable:$true] %s235_s20 }
   0xd   :  { %331 = vmatpush3.bf16.msra.mxu0 %v328_v8  ;;  %s363_s3 = scalar_lea.vmem %s236_s20, 256  ;;  %p368_p1 = scmp.lt.s32.totalorder %s236_s20, %s236_s20 }
   0xe   :  { %333 = vmatprep.subr.bf16.mxu0 %v332_v12  ;;  %353 = vmatprep.subr.bf16.mxu1 %v352_v28  ;;  %p364_p0 = scmp.ne.s32.totalorder %s236_s20, %s363_s3  ;;  %p369_p2 = scmp.lt.s32.totalorder %s363_s3, %s363_s3 }
   0xf   :  { %355 = vmatpush3.bf16.msra.mxu1 %v352_v28 }
  0x10   :  { %357 = vmatprep.subr.bf16.mxu1 %v356_v31  ;;  %p370_p3 = por %p369_p2, %p368_p1 }
  0x11   :  { %335 = vmatpush3.bf16.msra.mxu0 %v332_v12 }
  0x12   :  { %337 = vmatprep.subr.bf16.mxu0 %v336_v15  ;;  %p371_p4 = pnand %p370_p3, %p364_p0 }
  0x13   :  { %359 = vmatpush3.bf16.msra.mxu1 %v356_v31 }
  0x15   :  { %339 = vmatpush3.bf16.msra.mxu0 %v336_v15 }
  0x16   :  { %341 = vmatprep.subr.bf16.mxu0 %v340_v18 }
  0x19   :  { %343 = vmatpush3.bf16.msra.mxu0 %v340_v18 }
  0x1a   :  { %345 = vmatprep.subr.bf16.mxu0 %v344_v21 }
  0x1d   :  { %347 = vmatpush3.bf16.msra.mxu0 %v344_v21 }
  0x1e   :  { %349 = vmatprep.subr.bf16.mxu0 %v348_v24 }
  0x21   :  { %351 = vmatpush3.bf16.msra.mxu0 %v348_v24 }
  0x24   :  { %307 = vmatmul.mubr.f32.vlgmr.msra.gmra.mrb[0].mxu0 %v26_v25 }
  0xf7   :  { %v308_v33 = vpop.f32.mrb[0].mxu0 }
  0xf8   :  { %v122_v34 = vadd.f32 %v308_v33, %v246_v32  ;;  %v116_v35 = vpop.f32.mrb[1].mxu0 }
  0xf9   :  { %v117_v36 = vadd.f32 %v246_v32, %v116_v35 }
  0xfa   :  { %v126_v37 = vmax.f32 %v122_v34, 0.0 }
  0xfb   :  { %v125_v39 = vmax.f32 %v117_v36, 0.0 }
  0xfc   :  { %v135_v41 = vmul.f32 %v247_v38, %v126_v37 }
  0xfd   :  { %v134_v40 = vmul.f32 %v247_v38, %v125_v39 }
  0xff   :  { %317 = vmatprep.mubr.msk.f32.mxu1 %vm140_vm0, %v134_v40 }
 0x100   :  { %318 = vmatmul.mubr.msk.f32.vlgmr.msra.gmra.mrb[0].mxu1 %vm140_vm0, %v135_v41 }
 0x1d3   :  { %v319_v43 = vpop.f32.mrb[0].mxu1 }
 0x1d4   :  { %vm225_vm1 = vcmp.gt.f32.partialorder %v319_v43, %v223_v42  ;;  %v213_v44 = vpop.f32.mrb[1].mxu1 }
 0x1d5   :  { %v227_v45 = vsel %vm225_vm1, %v26_v25, 0.0  ;;  %vm224_vm2 = vcmp.gt.f32.partialorder %v213_v44, %v223_v42 }
 0x1d6   :  { %229 = vst [vmem:[#allocation3 + $0x8] sm:$0xff] %v227_v45  ;;  %v226_v46 = vsel %vm224_vm2, %v446_v9, 0.0 }
 0x1d7   :  { %228 = vst [vmem:[#allocation3] sm:$0xff] %v226_v46 }
 0x1d8   :  { %374 = shalt.err (!%p371_p4)
}
 0x1d9   :  { %s375_s22 = scalar_lea.hbm %s522_s6, 256 }
 0x1da   :  { %p376_p5 = scmp.ne.s32.totalorder %s522_s6, %s375_s22  ;;  %p379_p6 = scmp.lt.u32.totalorder %s375_s22, %s522_s6 }
 0x1dc   :  { %p381_p7 = pnand %p379_p6, %p376_p5 }
 0x1de   :  { %384 = shalt.err (!%p381_p7)
}
 0x1df   :  { %s388_s27 = smov 128   ;;  %s389_s28 = smov 8  }
 0x1e0   :  { %241 = dma.vmem_to_hbm [thread:$0]  %s236_s20, 256, %s522_s6, [#allocation4], %s388_s27, %s388_s27, %s389_s28  }
 0x1e1   :  { %385 = dma.done.wait [#allocation4], 256  }
 0x1e2   :  { %386 = vsyncadd [#allocation4], 4294967040 }
 0x1e3   :  { %245 = vsyncpa [#allocation4], 1 }

</bundles_post_ra>
